<compile_context>
chip_gen: v6e
topology: v6e:2x2x1
jax: 0.10.0
libtpu: 0.0.40
codegen_flags: <defaults>
</compile_context>

<pallas_src>
import math
import functools

import jax
import jax.numpy as jnp
from jax.experimental import pallas as pl
from jax.experimental.pallas import tpu as pltpu


# ------------------------------- Pallas kernel -------------------------------

def _pos_enc_kernel(x_ref, pe_ref, o_ref):
    # x_ref : (ts, B, D); pe_ref: (ts, 1, D) -> broadcast over batch in-register.
    o_ref[...] = x_ref[...] + pe_ref[...]


def _choose_seq_tile(S, B, D, itemsize, vmem_budget_bytes):
    """Largest seq tile whose double-buffered per-step footprint fits the budget."""
    # Per seq row, double-buffered: x block + out block (B*D each) + pe block (D).
    bytes_per_row = 2 * (2 * B + 1) * D * itemsize
    ts = max(8, vmem_budget_bytes // bytes_per_row)
    # Keep >= 2 grid steps so the "parallel" seq axis can actually shard across
    # both TensorCores on v7x (harmless on single-TC v5e/v6e).
    if S > 8:
        ts = min(ts, pl.cdiv(S, 2))
    ts = min(ts, S)
    if ts >= 8:
        ts = (ts // 8) * 8           # multiple of 8; sublane-friendly step size
    return max(1, min(ts, S))


def positional_encoding_forward(x, pe, *,
                                vmem_budget_bytes=24 * 1024 * 1024,
                                alias_input=False):
    """x: (S, B, D); pe: (max_len, 1, D). Returns x + pe[:S] (broadcast over B)."""
    S, B, D = x.shape
    max_len = pe.shape[0]
    if S > max_len:
        raise ValueError(f"sequence length {S} exceeds pe buffer length {max_len}")

    pe = pe.astype(x.dtype)          # keep the in-kernel add/store same-dtype

    if D % 128 != 0:
        # Lane-sparse last dim: masked partial stores would dominate a custom
        # kernel; the fused XLA broadcast-add is the better choice here.
        return x + pe[:S]

    itemsize = jnp.dtype(x.dtype).itemsize
    ts = _choose_seq_tile(S, B, D, itemsize, vmem_budget_bytes)
    grid = (pl.cdiv(S, ts),)

    cost = pl.CostEstimate(
        flops=S * B * D,
        transcendentals=0,
        bytes_accessed=(2 * S * B * D + S * D) * itemsize,
    )

    return pl.pallas_call(
        _pos_enc_kernel,
        out_shape=jax.ShapeDtypeStruct((S, B, D), x.dtype),
        grid=grid,
        in_specs=[
            pl.BlockSpec((ts, B, D), lambda i: (i, 0, 0)),
            # Full pe buffer; only the blocks covering rows [0, S) are streamed.
            pl.BlockSpec((ts, 1, D), lambda i: (i, 0, 0)),
        ],
        out_specs=pl.BlockSpec((ts, B, D), lambda i: (i, 0, 0)),
        compiler_params=pltpu.CompilerParams(
            dimension_semantics=("parallel",),
            vmem_limit_bytes=64 * 1024 * 1024,
        ),
        cost_estimate=cost,
        input_output_aliases={0: 0} if alias_input else {},
    )(x, pe)


# ------------------------- buffer creation (as in __init__) ------------------

def make_sinusoidal_pe(d_model, max_len=5000):
    """Replicates the PyTorch registered buffer: shape (max_len, 1, d_model)."""
    position = jnp.arange(max_len, dtype=jnp.float32)[:, None]
    div_term = jnp.exp(jnp.arange(0, d_model, 2, dtype=jnp.float32)
                       * (-math.log(10000.0) / d_model))
    pe = jnp.zeros((max_len, d_model), jnp.float32)
    pe = pe.at[:, 0::2].set(jnp.sin(position * div_term))
    pe = pe.at[:, 1::2].set(jnp.cos(position * div_term))
    return pe[:, None, :]            # (max_len, 1, d_model)


# ----------------------------------- main ------------------------------------

if __name__ == "__main__":
    SEQ, BATCH, D_MODEL = 16, 2, 128
    MAX_LEN = 5000

    pe = make_sinusoidal_pe(D_MODEL, MAX_LEN)
    key = jax.random.PRNGKey(0)
    x = jax.random.normal(key, (SEQ, BATCH, D_MODEL), dtype=jnp.float32)

    # Reference computed up front (x's buffer is donated to the kernel below).
    expected = x + pe[:SEQ]
    jax.block_until_ready(expected)

    fwd = jax.jit(
        functools.partial(positional_encoding_forward, alias_input=True),
        donate_argnums=(0,),
    )
    out = fwd(x, pe)
    jax.block_until_ready(out)

    assert out.shape == (SEQ, BATCH, D_MODEL)
    assert out.dtype == expected.dtype
    assert bool(jnp.all(jnp.isfinite(out)))
    assert bool(jnp.allclose(out, expected, rtol=1e-6, atol=1e-6))

    # Lane-sparse fallback path (D % 128 != 0) still matches the module.
    d_small = 32
    pe_small = make_sinusoidal_pe(d_small, 64)
    x_small = jax.random.normal(jax.random.PRNGKey(1), (8, 2, d_small), jnp.float32)
    out_small = positional_encoding_forward(x_small, pe_small)
    assert bool(jnp.allclose(out_small, x_small + pe_small[:8], rtol=1e-6, atol=1e-6))

    print("KERNEL_OK")
</pallas_src>

<mosaic_0001>
module attributes {stable_mosaic.version = 11 : i64} {
  func.func @_pos_enc_kernel(%arg0: i32, %arg1: memref<8x2x128xf32, #tpu.memory_space<vmem>>, %arg2: memref<8x1x128xf32, #tpu.memory_space<vmem>>, %arg3: memref<8x2x128xf32, #tpu.memory_space<vmem>>) attributes {dimension_semantics = [#tpu.dimension_semantics<parallel>], iteration_bounds = array<i64: 2>, scalar_prefetch = 0 : i64, scratch_operands = 0 : i64, tpu.core_type = #tpu.core_type<tc>, window_params = [{transform_indices = @transform_0, window_bounds = array<i64: 8, 2, 128>}, {transform_indices = @transform_1, window_bounds = array<i64: 8, 1, 128>}, {transform_indices = @transform_2, window_bounds = array<i64: 8, 2, 128>}]} {
    %c0 = arith.constant 0 : index
    %c0_0 = arith.constant 0 : index
    %c0_1 = arith.constant 0 : index
    %0 = vector.load %arg1[%c0, %c0_0, %c0_1] : memref<8x2x128xf32, #tpu.memory_space<vmem>>, vector<8x2x128xf32>
    %c0_2 = arith.constant 0 : index
    %c0_3 = arith.constant 0 : index
    %c0_4 = arith.constant 0 : index
    %1 = vector.load %arg2[%c0_2, %c0_3, %c0_4] : memref<8x1x128xf32, #tpu.memory_space<vmem>>, vector<8x1x128xf32>
    %2 = vector.broadcast %1 : vector<8x1x128xf32> to vector<8x2x128xf32>
    %3 = arith.addf %0, %2 : vector<8x2x128xf32>
    %c0_5 = arith.constant 0 : index
    %c0_6 = arith.constant 0 : index
    %c0_7 = arith.constant 0 : index
    %4 = vector.load %arg3[%c0_5, %c0_6, %c0_7] : memref<8x2x128xf32, #tpu.memory_space<vmem>>, vector<8x2x128xf32>
    tpu.vector_store %arg3[%c0_5, %c0_6, %c0_7], %3 {strides = array<i32>} : memref<8x2x128xf32, #tpu.memory_space<vmem>>, vector<8x2x128xf32>,
    return
  }
  func.func @transform_0(%arg0: i32) -> (i32, i32, i32) {
    %c0_i32 = arith.constant 0 : i32
    %c0_i32_0 = arith.constant 0 : i32
    %c0_i32_1 = arith.constant 0 : i32
    return %arg0, %c0_i32, %c0_i32_0 : i32, i32, i32
  }
  func.func @transform_1(%arg0: i32) -> (i32, i32, i32) {
    %c0_i32 = arith.constant 0 : i32
    %c0_i32_0 = arith.constant 0 : i32
    %c0_i32_1 = arith.constant 0 : i32
    return %arg0, %c0_i32, %c0_i32_0 : i32, i32, i32
  }
  func.func @transform_2(%arg0: i32) -> (i32, i32, i32) {
    %c0_i32 = arith.constant 0 : i32
    %c0_i32_0 = arith.constant 0 : i32
    %c0_i32_1 = arith.constant 0 : i32
    return %arg0, %c0_i32, %c0_i32_0 : i32, i32, i32
  }
}

</mosaic_0001>

<bundles_post_ra>
// kernel: positional_encoding_forward.1
= control target key start
LH: loop header
LB: loop body
LE: loop exit
PB: predicated region body
PF: predicated region fallthrough
CT: control target
= control target key end

     0   :  { %7 = vsyncpa [#allocation3], 0  ;;  %s873_s0 = inlined_call_operand.hbm [shape: f32[16,2,128], index: 0, kind: input, shape index: {}, may-alias: {0,2}]   ;;  %s874_s1 = inlined_call_operand.hbm [shape: f32[5000,1,128], index: 1, kind: input, shape index: {}]   ;;  %s875_s2 = inlined_call_operand.hbm [shape: f32[16,2,128], index: 2, kind: output, shape index: {}, may-alias: {0,2}]  }
   0x1   :  { %9 = vsyncpa [#allocation3 + $0x1], 0 }
   0x2   :  { %10 = vsyncpa [#allocation6], 0 }
   0x3   :  { %12 = vsyncpa [#allocation6 + $0x1], 0 }
   0x4   :  { %13 = vsyncpa [#allocation4], 0 }
   0x5   :  { %15 = vsyncpa [#allocation4 + $0x1], 0  ;;  %s631_s9 = smov 0   ;;  %s633_s10 = smov 0  }
   0x6   :  { %s635_s11 = smov 0   ;;  %s637_s12 = smov 0  }
   0x7 LB: > { %s652_s13 = sadd.s32 4294967295, %s605_s12   ;;  %s395_s14 = sadd.s32 4294967294, %s605_s12   ;;  %s605_s12 = sphi %s637_s12, %s891_s12   ;;  %s601_s11 = sphi %s635_s11, %s890_s11   ;;  %s597_s10 = sphi %s633_s10, %s889_s10   ;;  %s593_s9 = sphi %s631_s9, %s888_s9  }
   0x8   : > { %s656_s15 = sadd.s32 1, %s605_s12   ;;  %s28_s16 = sadd.s32 1, %s601_s11 }
   0x9   : > { %s25_s17 = ssub.s32 %s605_s12, %s656_s15  ;;  %p35_p0 = scmp.ne.s32.totalorder %s601_s11, %s597_s10 }
   0xa   : > { %p26_p1 = scmp.eq.s32.totalorder %s25_s17, 0  ;;  %p36_p2 = scmp.eq.s32.totalorder %s605_s12, 0 }
   0xb   : > { %p41_p3 = scmp.ne.s32.totalorder %s597_s10, %s593_s9  ;;  %p42_p4 = scmp.eq.s32.totalorder %s652_s13, 0 }
   0xc   : > { %s668_s18 = scalar_select %p26_p1, %s601_s11, %s28_s16  }
   0xd   : > { %p670_p5 = por %p36_p2, %p35_p0  ;;  %p674_p6 = por %p42_p4, %p41_p3 }
   0xe   : > { %p91_p7 = scmp.eq.s32.totalorder %s652_s13, 1  ;;  %p97_p8 = scmp.eq.s32.totalorder %s395_s14, 1 }
   0xf   : > { %s879_s20 = scalar_select %p674_p6, 1, 0 }
  0x10   : > { %p441_p10 = scmp.lt.s32.totalorder %s605_s12, 2  ;;  %p681_p11 = por %p91_p7, %p35_p0 }
  0x11   : > { %p685_p12 = por %p97_p8, %p41_p3  ;;  %s690_s23 = sand.u32 1, %s601_s11  }
  0x12   : > { %s880_s21 = scalar_select %p681_p11, 1, 0 }
  0x13   : > { %s881_s22 = scalar_select %p685_p12, 1, 0 }
  0x14   : > { %s421_s24 = sshll.u32 %s605_s12, 8  ;;  %s398_s25 = sshll.u32 %s690_s23, 4 }
  0x15   : > { %s697_s28 = scalar_lea.hbm %s873_s0, %s421_s24  ;;  %s121_s29 = scalar_lea.vmem [#allocation2], %s398_s25 }
  0x16   : > { %s128_s30 = sshll.u32 %s121_s29, 4  ;;  %p701_p13 = pnand %p441_p10, %p670_p5  ;;  %s705_s30 = int_to_ptr.vmem [resolvable:$true] %s128_s30 }
  0x17   : > { %s118_s4 = scalar_lea.sflag [#allocation3], %s690_s23  ;;  %s481_s5 = scalar_lea.hbm %s697_s28, 256 }
  0x18   : > { %p482_p0 = scmp.ne.s32.totalorder %s697_s28, %s481_s5  ;;  %p483_p1 = pneg %p701_p13 }
  0x19   : > { %s486_s8 = scalar_lea.hbm %s873_s0, 512  ;;  %p487_p4 = scmp.lt.s32.totalorder %s697_s28, %s873_s0 }
  0x1a   : > { %p484_p2 = pnand %p483_p1, %p482_p0  ;;  %p488_p5 = scmp.lt.s32.totalorder %s486_s8, %s481_s5 }
  0x1c   : > { %p485_p3 = pneg %p484_p2  ;;  %p489_p7 = por %p488_p5, %p487_p4 }
  0x1e   : > { %p490_p8 = pnand %p489_p7, %p485_p3 }
  0x20   : > { %493 = shalt.err (!%p490_p8)
}
  0x21   : > { %s494_s17 = scalar_lea.vmem %s705_s30, 256  ;;  %s607_s19 = smov [#allocation2]  }
  0x22   : > { %p495_p10 = scmp.ne.s32.totalorder %s705_s30, %s494_s17  ;;  %s499_s24 = sshll.u32 %s607_s19, 4  ;;  %s500_s24 = int_to_ptr.vmem [resolvable:$false] %s499_s24 }
  0x23   : > { %s501_s25 = scalar_lea.vmem %s500_s24, 512  ;;  %p502_p9 = scmp.lt.s32.totalorder %s705_s30, %s500_s24 }
  0x24   : > { %p497_p0 = pnand %p495_p10, %p483_p1  ;;  %p503_p12 = scmp.lt.s32.totalorder %s501_s25, %s494_s17 }
  0x26   : > { %p498_p2 = pneg %p497_p0  ;;  %p504_p11 = por %p503_p12, %p502_p9 }
  0x28   : > { %p505_p4 = pnand %p504_p11, %p498_p2 }
  0x2a   : > { %508 = shalt.err (!%p505_p4)
}
  0x2b   : > { %s608_s26 = smov 32   ;;  %s609_s27 = smov 2  }
  0x2c   : > { %433 = dma.hbm_to_vmem [thread:$0]  (!%p701_p13), %s697_s28, 256, %s705_s30, %s118_s4, %s608_s26, %s608_s26, %s609_s27  }
  0x2d   : > { %p404_p3 = scmp.ge.s32.totalorder %s605_s12, 1  ;;  %p157_p5 = scmp.lt.s32.totalorder %s605_s12, 3 }
  0x2e   : > { %s401_s29 = sshll.u32 %s690_s23, 3  ;;  %s422_s6 = sshll.u32 %s605_s12, 7 }
  0x2f   : > { %p737_p9 = pnand %p404_p3, %p157_p5  ;;  %s142_s7 = scalar_lea.vmem [#allocation5], %s401_s29 }
  0x30   : > { %s149_s8 = sshll.u32 %s142_s7, 4  ;;  %s745_s17 = scalar_lea.hbm %s874_s1, %s422_s6  ;;  %s747_s8 = int_to_ptr.vmem [resolvable:$true] %s149_s8 }
  0x31   : > { %s139_s28 = scalar_lea.sflag [#allocation6], %s690_s23  ;;  %s509_s30 = scalar_lea.hbm %s745_s17, 128 }
  0x32   : > { %p510_p11 = scmp.ne.s32.totalorder %s745_s17, %s509_s30  ;;  %s514_s24 = scalar_lea.hbm %s874_s1, 80000 }
  0x33   : > { %p515_p8 = scmp.lt.s32.totalorder %s745_s17, %s874_s1  ;;  %p516_p10 = scmp.lt.s32.totalorder %s514_s24, %s509_s30 }
  0x34   : > { %p512_p12 = pnand %p510_p11, %p483_p1 }
  0x35   : > { %p517_p0 = por %p516_p10, %p515_p8 }
  0x36   : > { %p513_p7 = pneg %p512_p12 }
  0x38   : > { %p518_p2 = pnand %p517_p0, %p513_p7 }
  0x3a   : > { %521 = shalt.err (!%p518_p2)
}
  0x3b   : > { %s522_s27 = scalar_lea.vmem %s747_s8, 128  ;;  %s610_s29 = smov [#allocation5]  }
  0x3c   : > { %p523_p4 = scmp.ne.s32.totalorder %s747_s8, %s522_s27  ;;  %s527_s6 = sshll.u32 %s610_s29, 4  ;;  %s528_s6 = int_to_ptr.vmem [resolvable:$false] %s527_s6 }
  0x3d   : > { %s529_s7 = scalar_lea.vmem %s528_s6, 256  ;;  %p530_p11 = scmp.lt.s32.totalorder %s747_s8, %s528_s6 }
  0x3e   : > { %p525_p3 = pnand %p523_p4, %p483_p1  ;;  %p531_p12 = scmp.lt.s32.totalorder %s529_s7, %s522_s27 }
  0x40   : > { %p526_p5 = pneg %p525_p3  ;;  %p532_p6 = por %p531_p12, %p530_p11 }
  0x42   : > { %p533_p8 = pnand %p532_p6, %p526_p5 }
  0x44   : > { %536 = shalt.err (!%p533_p8)
}
  0x45   : > { %s611_s14 = smov 16   ;;  %s612_s16 = smov 1  }
  0x46   : > { %436 = dma.hbm_to_vmem [thread:$0]  (!%p701_p13), %s745_s17, 128, %s747_s8, %s139_s28, %s611_s14, %s611_s14, %s612_s16  }
  0x47   : > { %161 = sbr.rel (%p737_p9) target bundleno = 111 (0x6f), region = 28  ;;  %s777_s30 = sand.u32 (!%p737_p9), 1, %s597_s10  }
  0x48   : > { %s405_s4 = sshll.u32 (!%p737_p9), %s777_s30, 4  ;;  %s164_s19 = scalar_lea.sflag (!%p737_p9), [#allocation3], %s777_s30 }
  0x49   : > { %s781_s24 = scalar_lea.vmem (!%p737_p9), [#allocation2], %s405_s4  ;;  %p884_p6 = scmp.ne.s32.totalorder (!%p737_p9), %s879_s20, 0 }
  0x4c   : > { %580 = dma.done.wait (%p884_p6), %s164_s19, 256  }
  0x4d   : > { %582 = vsyncadd (%p884_p6), %s164_s19, 4294967040  ;;  %s406_s23 = sshll.u32 %s777_s30, 3  ;;  %s173_s3 = scalar_lea.sflag [#allocation6], %s777_s30 }
  0x4e   : > { %s789_s5 = scalar_lea.vmem [#allocation5], %s406_s23 }
  0x4f   : > { %584 = dma.done.wait (%p884_p6), %s173_s3, 128  }
  0x50   : > { %586 = vsyncadd (%p884_p6), %s173_s3, 4294967168  ;;  %s795_s8 = scalar_lea.vmem [#allocation7], %s405_s4  ;;  %s423_s28 = sshll.u32 %s652_s13, 8  ;;  %v205_v0 = vld [vmem:[%s781_s24] sm:$0x3] }
  0x51   : > { %s299_s17 = sshll.u32 %s795_s8, 4  ;;  %v408_v1 = vld [vmem:[%s789_s5] ss:$0 sm:$0xff]  ;;  %v206_v2 = vld [vmem:[%s781_s24 + $0x2] sm:$0x3]  ;;  %s826_s26 = scalar_lea.hbm %s875_s2, %s423_s28  ;;  %s817_s17 = int_to_ptr.vmem [resolvable:$true] %s299_s17 }
  0x52   : > { %v269_v3 = vadd.f32 %v408_v1, %v205_v0  ;;  %v409_v4 = vld [vmem:[%s789_s5 + $0x1] ss:$0 sm:$0xff]  ;;  %v207_v5 = vld [vmem:[%s781_s24 + $0x4] sm:$0x3]  ;;  %v410_v6 = vld [vmem:[%s789_s5 + $0x2] ss:$0 sm:$0xff] }
  0x53   : > { %v270_v7 = vadd.f32 %v409_v4, %v206_v2  ;;  %v271_v8 = vadd.f32 %v410_v6, %v207_v5  ;;  %v208_v9 = vld [vmem:[%s781_s24 + $0x6] sm:$0x3]  ;;  %v411_v10 = vld [vmem:[%s789_s5 + $0x3] ss:$0 sm:$0xff]  ;;  %v209_v11 = vld [vmem:[%s781_s24 + $0x8] sm:$0x3] }
  0x54   : > { %277 = vst [vmem:[%s795_s8] sm:$0x3] %v269_v3  ;;  %v272_v12 = vadd.f32 %v411_v10, %v208_v9  ;;  %v412_v13 = vld [vmem:[%s789_s5 + $0x4] ss:$0 sm:$0xff]  ;;  %v210_v14 = vld [vmem:[%s781_s24 + $0xa] sm:$0x3]  ;;  %s286_s27 = scalar_lea.sflag [#allocation4], %s777_s30 }
  0x55   : > { %v413_v15 = vld [vmem:[%s789_s5 + $0x5] ss:$0 sm:$0xff]  ;;  %278 = vst [vmem:[%s795_s8 + $0x2] sm:$0x3] %v270_v7  ;;  %279 = vst [vmem:[%s795_s8 + $0x4] sm:$0x3] %v271_v8  ;;  %v273_v16 = vadd.f32 %v412_v13, %v209_v11 }
  0x56   : > { %v274_v17 = vadd.f32 %v413_v15, %v210_v14  ;;  %v211_v18 = vld [vmem:[%s781_s24 + $0xc] sm:$0x3]  ;;  %v414_v19 = vld [vmem:[%s789_s5 + $0x6] ss:$0 sm:$0xff]  ;;  %v212_v20 = vld [vmem:[%s781_s24 + $0xe] sm:$0x3] }
  0x57   : > { %280 = vst [vmem:[%s795_s8 + $0x6] sm:$0x3] %v272_v12  ;;  %v275_v21 = vadd.f32 %v414_v19, %v211_v18  ;;  %v415_v22 = vld [vmem:[%s789_s5 + $0x7] ss:$0 sm:$0xff]  ;;  %281 = vst [vmem:[%s795_s8 + $0x8] sm:$0x3] %v273_v16 }
  0x58   : > { %282 = vst [vmem:[%s795_s8 + $0xa] sm:$0x3] %v274_v17  ;;  %v276_v23 = vadd.f32 %v415_v22, %v212_v20  ;;  %s537_s29 = scalar_lea.vmem %s817_s17, 256  ;;  %p885_p1 = scmp.ne.s32.totalorder %s880_s21, 0 }
  0x59   : > { %283 = vst [vmem:[%s795_s8 + $0xc] sm:$0x3] %v275_v21  ;;  %p538_p13 = scmp.ne.s32.totalorder %s817_s17, %s537_s29  ;;  %s613_s6 = smov [#allocation7]  }
  0x5a   : > { %284 = vst [vmem:[%s795_s8 + $0xe] sm:$0x3] %v276_v23  ;;  %s541_s7 = sshll.u32 %s613_s6, 4  ;;  %s542_s7 = int_to_ptr.vmem [resolvable:$false] %s541_s7 }
  0x5b   : > { %p539_p9 = pnand %p538_p13, %p885_p1  ;;  %s543_s13 = scalar_lea.vmem %s542_s7, 512 }
  0x5c   : > { %p544_p10 = scmp.lt.s32.totalorder %s817_s17, %s542_s7  ;;  %p545_p0 = scmp.lt.s32.totalorder %s543_s13, %s537_s29 }
  0x5d   : > { %p540_p7 = pneg %p539_p9 }
  0x5e   : > { %p546_p2 = por %p545_p0, %p544_p10 }
  0x60   : > { %p547_p4 = pnand %p546_p2, %p540_p7 }
  0x62   : > { %550 = shalt.err (!%p547_p4)
}
  0x63   : > { %s551_s14 = scalar_lea.hbm %s826_s26, 256  ;;  %s555_s19 = scalar_lea.hbm %s875_s2, 512 }
  0x64   : > { %p552_p3 = scmp.ne.s32.totalorder %s826_s26, %s551_s14  ;;  %p556_p12 = scmp.lt.s32.totalorder %s826_s26, %s875_s2 }
  0x65   : > { %p557_p8 = scmp.lt.s32.totalorder %s555_s19, %s551_s14 }
  0x66   : > { %p553_p5 = pnand %p552_p3, %p885_p1 }
  0x67   : > { %p558_p6 = por %p557_p8, %p556_p12 }
  0x68   : > { %p554_p11 = pneg %p553_p5 }
  0x6a   : > { %p559_p13 = pnand %p558_p6, %p554_p11 }
  0x6c   : > { %562 = shalt.err (!%p559_p13)
}
  0x6d   : > { %s614_s3 = smov 32   ;;  %s615_s5 = smov 2  }
  0x6e   : > { %428 = dma.vmem_to_hbm [thread:$0]  (%p885_p1), %s817_s17, 256, %s826_s26, %s286_s27, %s614_s3, %s614_s3, %s615_s5  }
  0x6f PF: > { %s314_s8 = sand.u32 1, %s593_s9   ;;  %p886_p9 = scmp.ne.s32.totalorder %s881_s22, 0 }
  0x70   : > { %p887_p7 = scmp.ge.s32.totalorder %s605_s12, 2  ;;  %s315_s28 = scalar_lea.sflag [#allocation4], %s314_s8 }
  0x72   : > { %p438_p10 = pnand %p887_p7, %p886_p9 }
  0x74   : > { %p439_p0 = pneg %p438_p10 }
  0x76   : > { %588 = dma.done.wait (%p439_p0), %s315_s28, 256  }
  0x77   : > { %590 = vsyncadd (%p439_p0), %s315_s28, 4294967040  ;;  %p18_p2 = scmp.ge.s32.totalorder %s656_s15, 4   ;;  %s888_s9 = smov %s597_s10 }
  0x78   : > { %s889_s10 = smov %s601_s11  ;;  %s890_s11 = smov %s668_s18 }
  0x79   : > { %s891_s12 = smov %s656_s15  ;;  %20 = sbr.rel (!%p18_p2) target bundleno = 7 (0x7), region = 86 }
  0x7e   :  { %320 = vsyncpa [#allocation3], 1 }
  0x7f   :  { %322 = vsyncpa [#allocation3 + $0x1], 1 }
  0x80   :  { %323 = vsyncpa [#allocation6], 1 }
  0x81   :  { %325 = vsyncpa [#allocation6 + $0x1], 1 }
  0x82   :  { %326 = vsyncpa [#allocation4], 1 }
  0x83   :  { %328 = vsyncpa [#allocation4 + $0x1], 1 }

</bundles_post_ra>
